<compile_context>
chip_gen: v7x
topology: tpu7x:2x2x1
jax: 0.10.0
libtpu: 0.0.40
codegen_flags: <defaults>
</compile_context>

<pallas_src>
import functools

import jax
import jax.numpy as jnp
from jax import lax
from jax.experimental import pallas as pl
from jax.experimental.pallas import tpu as pltpu


def _round_up(x, m):
    return ((x + m - 1) // m) * m


def _round_down(x, m):
    return (x // m) * m


def _physical_vmem_bytes():
    """Per-TensorCore VMEM capacity; conservative 64 MiB (v7x) fallback."""
    try:
        return int(pltpu.get_tpu_info().vmem_capacity_bytes)
    except Exception:
        return 64 << 20


def _tile_footprint_per_row(D, itemsize):
    """VMEM bytes per tile row: 3 double-buffered input blocks plus the
    in-kernel f32 upcast / product temporaries (charged against the budget)."""
    lane_d = _round_up(max(D, 128), 128)          # lane padding for D < 128
    per_row = 3 * 2 * lane_d * itemsize           # a/p/n blocks, 2-deep pipeline
    per_row += 4 * lane_d * 4                     # f32 temporaries in the body
    return per_row


def _choose_tile_rows(B, D, itemsize, vmem_total):
    """Rows per tile: multiple of 8, sized so double-buffered inputs plus the
    in-kernel f32 temporaries stay within ~1/3 of physical VMEM (128 MiB on
    v5e/v6e, 64 MiB per TensorCore on v7x)."""
    budget = min(vmem_total // 3, 32 << 20)
    per_row = _tile_footprint_per_row(D, itemsize)
    max_rows = _round_down(max(int(budget // per_row), 8), 8)
    max_rows = min(max(max_rows, 8), 8192)
    if B <= max_rows:
        if B >= 1024:
            # Keep >= 2 grid steps so both TensorCores get work on v7x.
            return _round_up(pl.cdiv(B, 2), 8)
        return B                                  # single full-extent block
    return max_rows


def _triplet_kernel(a_ref, p_ref, n_ref, pos_ref, neg_ref, loss_ref, *,
                    margin, distance_metric):
    a = a_ref[...]
    p = p_ref[...]
    n = n_ref[...]

    def rowsum_f32(x):
        # f32 accumulation; elementwise products stay in the input dtype
        # (bf16 VALU on v6e/v7x, compiler-upcast on v5e).
        return jnp.sum(x.astype(jnp.float32), axis=1, keepdims=True)

    if distance_metric == 'cosine':
        # rsqrt(max(||x||^2, eps^2)) == 1 / max(||x||, eps)  (F.normalize eps=1e-12)
        eps2 = jnp.float32(1e-12) * jnp.float32(1e-12)
        dot_ap = rowsum_f32(a * p)
        dot_an = rowsum_f32(a * n)
        inv_a = lax.rsqrt(jnp.maximum(rowsum_f32(a * a), eps2))
        inv_p = lax.rsqrt(jnp.maximum(rowsum_f32(p * p), eps2))
        inv_n = lax.rsqrt(jnp.maximum(rowsum_f32(n * n), eps2))
        pos_dist = 1.0 - dot_ap * (inv_a * inv_p)
        neg_dist = 1.0 - dot_an * (inv_a * inv_n)
    else:  # 'euclidean'  (spec uses plain sqrt(sum(diff^2)) — no eps)
        dp = (a - p).astype(jnp.float32)
        dn = (a - n).astype(jnp.float32)
        pos_dist = jnp.sqrt(jnp.sum(dp * dp, axis=1, keepdims=True))
        neg_dist = jnp.sqrt(jnp.sum(dn * dn, axis=1, keepdims=True))

    lps = jnp.maximum(jnp.float32(margin) + pos_dist - neg_dist, 0.0)

    # Three separate column stores — no cross-lane concatenate in the epilogue.
    pos_ref[...] = pos_dist
    neg_ref[...] = neg_dist
    loss_ref[...] = lps


def triplet_loss_with_metrics(anchor, positive, negative,
                              margin=0.3, distance_metric='cosine',
                              reduction='mean', return_metrics=False,
                              tile_rows=None):
    if distance_metric not in ('cosine', 'euclidean'):
        raise ValueError(f'Unsupported distance metric: {distance_metric}')

    B, D = anchor.shape
    itemsize = jnp.dtype(anchor.dtype).itemsize
    vmem_total = _physical_vmem_bytes()

    if tile_rows is None:
        tb = _choose_tile_rows(B, D, itemsize, vmem_total)
    else:
        tb = min(int(tile_rows), B)
    grid = (pl.cdiv(B, tb),)

    # VMEM limit sized to the chosen blocks (v5e's scoped default is only 16 MiB).
    est = tb * _tile_footprint_per_row(D, itemsize) + (4 << 20)
    vmem_limit = int(min(vmem_total * 3 // 4, max(32 << 20, 2 * est)))

    kernel = functools.partial(_triplet_kernel, margin=float(margin),
                               distance_metric=distance_metric)

    cost = pl.CostEstimate(
        flops=(10 if distance_metric == 'cosine' else 8) * B * D,
        transcendentals=(3 if distance_metric == 'cosine' else 2) * B,
        bytes_accessed=3 * B * D * itemsize + 3 * B * 4,
    )

    pos_col, neg_col, lps_col = pl.pallas_call(
        kernel,
        out_shape=(jax.ShapeDtypeStruct((B, 1), jnp.float32),
                   jax.ShapeDtypeStruct((B, 1), jnp.float32),
                   jax.ShapeDtypeStruct((B, 1), jnp.float32)),
        grid=grid,
        in_specs=[
            pl.BlockSpec((tb, D), lambda i: (i, 0)),
            pl.BlockSpec((tb, D), lambda i: (i, 0)),
            pl.BlockSpec((tb, D), lambda i: (i, 0)),
        ],
        out_specs=[
            pl.BlockSpec((tb, 1), lambda i: (i, 0)),
            pl.BlockSpec((tb, 1), lambda i: (i, 0)),
            pl.BlockSpec((tb, 1), lambda i: (i, 0)),
        ],
        compiler_params=pltpu.CompilerParams(
            dimension_semantics=("parallel",),
            vmem_limit_bytes=vmem_limit),
        cost_estimate=cost,
    )(anchor, positive, negative)
    # TODO(synk): D<128 lane-pack ((B,D)->(B//f, f*D) wrapper reshape + segmented
    # in-kernel reduction) would recover 128/D lane utilization on v7x / bf16-v6e;
    # skipped (layout plumbing only, HBM traffic unchanged).
    # TODO(synk): pallas_call has no autodiff rule — wrap in jax.custom_vjp with a
    # closed-form per-sample backward kernel if this loss is used for training.

    pos_dist = pos_col[:, 0]
    neg_dist = neg_col[:, 0]
    lps = lps_col[:, 0]

    # Scalar reduction stays outside the kernel so the grid axis stays parallel.
    if reduction == 'mean':
        loss = jnp.mean(lps)
    elif reduction == 'sum':
        loss = jnp.sum(lps)
    else:
        loss = lps

    if not return_metrics:
        return loss

    active = (lps > 0).astype(jnp.float32)
    metrics = {
        'avg_positive_distance': jnp.mean(pos_dist),
        'avg_negative_distance': jnp.mean(neg_dist),
        'avg_margin_violation': jnp.mean(lps),
        'num_active_triplets': jnp.sum(active).astype(jnp.int32),
        'fraction_active_triplets': jnp.mean(active),
        'hardest_positive_distance': jnp.max(pos_dist),
        'easiest_negative_distance': jnp.min(neg_dist),
    }
    return loss, metrics


def _reference(anchor, positive, negative, margin=0.3, metric='cosine',
               reduction='mean'):
    anchor = anchor.astype(jnp.float32)
    positive = positive.astype(jnp.float32)
    negative = negative.astype(jnp.float32)
    if metric == 'cosine':
        def norm(x):
            return x / jnp.maximum(
                jnp.linalg.norm(x, axis=1, keepdims=True), 1e-12)
        a, p, n = norm(anchor), norm(positive), norm(negative)
        pos = 1.0 - jnp.sum(a * p, axis=1)
        neg = 1.0 - jnp.sum(a * n, axis=1)
    else:
        pos = jnp.sqrt(jnp.sum((anchor - positive) ** 2, axis=1))
        neg = jnp.sqrt(jnp.sum((anchor - negative) ** 2, axis=1))
    lps = jnp.maximum(margin + pos - neg, 0.0)
    if reduction == 'mean':
        return jnp.mean(lps)
    if reduction == 'sum':
        return jnp.sum(lps)
    return lps


if __name__ == "__main__":
    key = jax.random.PRNGKey(0)

    # --- Case 1: small single-block case, cosine + metrics (module defaults) ---
    k1, k2, k3 = jax.random.split(key, 3)
    B, D = 8, 32
    anchor = jax.random.normal(k1, (B, D), dtype=jnp.float32)
    positive = jax.random.normal(k2, (B, D), dtype=jnp.float32)
    negative = jax.random.normal(k3, (B, D), dtype=jnp.float32)

    loss, metrics = triplet_loss_with_metrics(
        anchor, positive, negative, margin=0.3,
        distance_metric='cosine', reduction='mean', return_metrics=True)
    loss = jax.block_until_ready(loss)
    metrics = {k: jax.block_until_ready(v) for k, v in metrics.items()}

    ref = _reference(anchor, positive, negative, margin=0.3)
    assert jnp.allclose(loss, ref, atol=1e-5, rtol=1e-5), (loss, ref)

    # --- Case 2: multi-tile path (partial last tile) over the batch axis ---
    k4, k5, k6 = jax.random.split(jax.random.PRNGKey(1), 3)
    B2, D2 = 40, 32
    a2 = jax.random.normal(k4, (B2, D2), dtype=jnp.float32)
    p2 = jax.random.normal(k5, (B2, D2), dtype=jnp.float32)
    n2 = jax.random.normal(k6, (B2, D2), dtype=jnp.float32)

    lps2 = triplet_loss_with_metrics(
        a2, p2, n2, margin=0.3, distance_metric='cosine',
        reduction='none', tile_rows=16)
    lps2 = jax.block_until_ready(lps2)
    ref2 = _reference(a2, p2, n2, margin=0.3, reduction='none')
    assert jnp.allclose(lps2, ref2, atol=1e-5, rtol=1e-5), (lps2, ref2)

    # --- Case 3: euclidean metric, sum reduction ---
    loss3 = triplet_loss_with_metrics(
        a2, p2, n2, margin=0.3, distance_metric='euclidean', reduction='sum')
    loss3 = jax.block_until_ready(loss3)
    ref3 = _reference(a2, p2, n2, margin=0.3, metric='euclidean',
                      reduction='sum')
    assert jnp.allclose(loss3, ref3, atol=1e-4, rtol=1e-5), (loss3, ref3)

    # --- Case 4: bf16 inputs (native-dtype products, f32 accumulation) ---
    k7, k8, k9 = jax.random.split(jax.random.PRNGKey(2), 3)
    B4, D4 = 24, 128
    a4 = jax.random.normal(k7, (B4, D4), dtype=jnp.bfloat16)
    p4 = jax.random.normal(k8, (B4, D4), dtype=jnp.bfloat16)
    n4 = jax.random.normal(k9, (B4, D4), dtype=jnp.bfloat16)

    lps4 = triplet_loss_with_metrics(
        a4, p4, n4, margin=0.3, distance_metric='cosine', reduction='none')
    lps4 = jax.block_until_ready(lps4)
    ref4 = _reference(a4, p4, n4, margin=0.3, reduction='none')
    assert jnp.allclose(lps4, ref4, atol=2e-2, rtol=2e-2), (lps4, ref4)

    print("KERNEL_OK")
</pallas_src>

<mosaic_0001>
module attributes {stable_mosaic.version = 11 : i64} {
  func.func @_triplet_kernel(%arg0: i32, %arg1: memref<8x32xf32, #tpu.memory_space<vmem>>, %arg2: memref<8x32xf32, #tpu.memory_space<vmem>>, %arg3: memref<8x32xf32, #tpu.memory_space<vmem>>, %arg4: memref<8x1xf32, #tpu.memory_space<vmem>>, %arg5: memref<8x1xf32, #tpu.memory_space<vmem>>, %arg6: memref<8x1xf32, #tpu.memory_space<vmem>>) attributes {dimension_semantics = [#tpu.dimension_semantics<parallel>], iteration_bounds = array<i64: 1>, scalar_prefetch = 0 : i64, scratch_operands = 0 : i64, tpu.core_type = #tpu.core_type<tc>, window_params = [{transform_indices = @transform_0, window_bounds = array<i64: 8, 32>}, {transform_indices = @transform_1, window_bounds = array<i64: 8, 32>}, {transform_indices = @transform_2, window_bounds = array<i64: 8, 32>}, {transform_indices = @transform_3, window_bounds = array<i64: 8, 1>}, {transform_indices = @transform_4, window_bounds = array<i64: 8, 1>}, {transform_indices = @transform_5, window_bounds = array<i64: 8, 1>}]} {
    %c0 = arith.constant 0 : index
    %c0_0 = arith.constant 0 : index
    %0 = vector.load %arg1[%c0, %c0_0] : memref<8x32xf32, #tpu.memory_space<vmem>>, vector<8x32xf32>
    %c0_1 = arith.constant 0 : index
    %c0_2 = arith.constant 0 : index
    %1 = vector.load %arg2[%c0_1, %c0_2] : memref<8x32xf32, #tpu.memory_space<vmem>>, vector<8x32xf32>
    %c0_3 = arith.constant 0 : index
    %c0_4 = arith.constant 0 : index
    %2 = vector.load %arg3[%c0_3, %c0_4] : memref<8x32xf32, #tpu.memory_space<vmem>>, vector<8x32xf32>
    %cst = arith.constant 9.99999996E-13 : f32
    %cst_5 = arith.constant 9.99999996E-13 : f32
    %3 = arith.mulf %cst, %cst_5 : f32
    %4 = arith.mulf %0, %1 : vector<8x32xf32>
    %cst_6 = arith.constant dense<0.000000e+00> : vector<8xf32>
    %5 = vector.multi_reduction <add>, %4, %cst_6 [1] : vector<8x32xf32> to vector<8xf32>
    %6 = vector.shape_cast %5 : vector<8xf32> to vector<8x1xf32>
    %7 = arith.mulf %0, %2 : vector<8x32xf32>
    %cst_7 = arith.constant dense<0.000000e+00> : vector<8xf32>
    %8 = vector.multi_reduction <add>, %7, %cst_7 [1] : vector<8x32xf32> to vector<8xf32>
    %9 = vector.shape_cast %8 : vector<8xf32> to vector<8x1xf32>
    %10 = arith.mulf %0, %0 : vector<8x32xf32>
    %cst_8 = arith.constant dense<0.000000e+00> : vector<8xf32>
    %11 = vector.multi_reduction <add>, %10, %cst_8 [1] : vector<8x32xf32> to vector<8xf32>
    %12 = vector.shape_cast %11 : vector<8xf32> to vector<8x1xf32>
    %13 = vector.broadcast %3 : f32 to vector<8x1xf32>
    %14 = arith.maximumf %12, %13 : vector<8x1xf32>
    %15 = math.rsqrt %14 : vector<8x1xf32>
    %16 = arith.mulf %1, %1 : vector<8x32xf32>
    %cst_9 = arith.constant dense<0.000000e+00> : vector<8xf32>
    %17 = vector.multi_reduction <add>, %16, %cst_9 [1] : vector<8x32xf32> to vector<8xf32>
    %18 = vector.shape_cast %17 : vector<8xf32> to vector<8x1xf32>
    %19 = vector.broadcast %3 : f32 to vector<8x1xf32>
    %20 = arith.maximumf %18, %19 : vector<8x1xf32>
    %21 = math.rsqrt %20 : vector<8x1xf32>
    %22 = arith.mulf %2, %2 : vector<8x32xf32>
    %cst_10 = arith.constant dense<0.000000e+00> : vector<8xf32>
    %23 = vector.multi_reduction <add>, %22, %cst_10 [1] : vector<8x32xf32> to vector<8xf32>
    %24 = vector.shape_cast %23 : vector<8xf32> to vector<8x1xf32>
    %25 = vector.broadcast %3 : f32 to vector<8x1xf32>
    %26 = arith.maximumf %24, %25 : vector<8x1xf32>
    %27 = math.rsqrt %26 : vector<8x1xf32>
    %28 = arith.mulf %15, %21 : vector<8x1xf32>
    %29 = arith.mulf %6, %28 : vector<8x1xf32>
    %cst_11 = arith.constant 1.000000e+00 : f32
    %30 = vector.broadcast %cst_11 : f32 to vector<8x1xf32>
    %31 = arith.subf %30, %29 : vector<8x1xf32>
    %32 = arith.mulf %15, %27 : vector<8x1xf32>
    %33 = arith.mulf %9, %32 : vector<8x1xf32>
    %cst_12 = arith.constant 1.000000e+00 : f32
    %34 = vector.broadcast %cst_12 : f32 to vector<8x1xf32>
    %35 = arith.subf %34, %33 : vector<8x1xf32>
    %cst_13 = arith.constant 3.000000e-01 : f32
    %36 = vector.broadcast %cst_13 : f32 to vector<8x1xf32>
    %37 = arith.addf %36, %31 : vector<8x1xf32>
    %38 = arith.subf %37, %35 : vector<8x1xf32>
    %cst_14 = arith.constant 0.000000e+00 : f32
    %39 = vector.broadcast %cst_14 : f32 to vector<8x1xf32>
    %40 = arith.maximumf %38, %39 : vector<8x1xf32>
    %c0_15 = arith.constant 0 : index
    %c0_16 = arith.constant 0 : index
    %41 = vector.load %arg4[%c0_15, %c0_16] : memref<8x1xf32, #tpu.memory_space<vmem>>, vector<8x1xf32>
    tpu.vector_store %arg4[%c0_15, %c0_16], %31 {strides = array<i32>} : memref<8x1xf32, #tpu.memory_space<vmem>>, vector<8x1xf32>,
    %c0_17 = arith.constant 0 : index
    %c0_18 = arith.constant 0 : index
    %42 = vector.load %arg5[%c0_17, %c0_18] : memref<8x1xf32, #tpu.memory_space<vmem>>, vector<8x1xf32>
    tpu.vector_store %arg5[%c0_17, %c0_18], %35 {strides = array<i32>} : memref<8x1xf32, #tpu.memory_space<vmem>>, vector<8x1xf32>,
    %c0_19 = arith.constant 0 : index
    %c0_20 = arith.constant 0 : index
    %43 = vector.load %arg6[%c0_19, %c0_20] : memref<8x1xf32, #tpu.memory_space<vmem>>, vector<8x1xf32>
    tpu.vector_store %arg6[%c0_19, %c0_20], %40 {strides = array<i32>} : memref<8x1xf32, #tpu.memory_space<vmem>>, vector<8x1xf32>,
    return
  }
  func.func @transform_0(%arg0: i32) -> (i32, i32) {
    %c0_i32 = arith.constant 0 : i32
    %c0_i32_0 = arith.constant 0 : i32
    return %arg0, %c0_i32 : i32, i32
  }
  func.func @transform_1(%arg0: i32) -> (i32, i32) {
    %c0_i32 = arith.constant 0 : i32
    %c0_i32_0 = arith.constant 0 : i32
    return %arg0, %c0_i32 : i32, i32
  }
  func.func @transform_2(%arg0: i32) -> (i32, i32) {
    %c0_i32 = arith.constant 0 : i32
    %c0_i32_0 = arith.constant 0 : i32
    return %arg0, %c0_i32 : i32, i32
  }
  func.func @transform_3(%arg0: i32) -> (i32, i32) {
    %c0_i32 = arith.constant 0 : i32
    %c0_i32_0 = arith.constant 0 : i32
    return %arg0, %c0_i32 : i32, i32
  }
  func.func @transform_4(%arg0: i32) -> (i32, i32) {
    %c0_i32 = arith.constant 0 : i32
    %c0_i32_0 = arith.constant 0 : i32
    return %arg0, %c0_i32 : i32, i32
  }
  func.func @transform_5(%arg0: i32) -> (i32, i32) {
    %c0_i32 = arith.constant 0 : i32
    %c0_i32_0 = arith.constant 0 : i32
    return %arg0, %c0_i32 : i32, i32
  }
}

</mosaic_0001>

<bundles_post_ra>
// kernel: tpu_custom_call.1
= control target key start
LH: loop header
LB: loop body
LE: loop exit
PB: predicated region body
PF: predicated region fallthrough
CT: control target
= control target key end

     0   :  { %11 = vsyncpa [#allocation3], 0  ;;  %s271_s0 = inlined_call_operand.hbm [shape: f32[8,32], index: 0, kind: input, shape index: {}]   ;;  %s272_s1 = inlined_call_operand.hbm [shape: f32[8,32], index: 1, kind: input, shape index: {}]   ;;  %s273_s2 = inlined_call_operand.hbm [shape: f32[8,32], index: 2, kind: input, shape index: {}]   ;;  %s274_s3 = inlined_call_operand.vmem [shape: f32[8,1], index: 3, kind: output, shape index: {0}]   ;;  %s275_s4 = inlined_call_operand.vmem [shape: f32[8,1], index: 4, kind: output, shape index: {1}]   ;;  %s276_s5 = inlined_call_operand.vmem [shape: f32[8,1], index: 5, kind: output, shape index: {2}]  }
   0x1   :  { %12 = vsyncpa [#allocation5], 0  ;;  %s188_s18 = smov [#allocation4]   ;;  %s189_s20 = smov [#allocation2]  }
   0x2   :  { %s29_s19 = sshll.u32 %s188_s18, 4  ;;  %s19_s21 = sshll.u32 %s189_s20, 4  ;;  %s30_s19 = int_to_ptr.vmem [resolvable:$true] %s29_s19  ;;  %s20_s21 = int_to_ptr.vmem [resolvable:$true] %s19_s21 }
   0x3   :  { %s118_s24 = scalar_lea.hbm %s272_s1, 128 }
   0x4   :  { %p119_p0 = scmp.ne.s32.totalorder %s272_s1, %s118_s24  ;;  %p122_p1 = scmp.lt.u32.totalorder %s118_s24, %s272_s1 }
   0x6   :  { %p124_p2 = pnand %p122_p1, %p119_p0 }
   0x8   :  { %127 = shalt.err (!%p124_p2)
}
   0x9   :  { %s128_s29 = scalar_lea.vmem %s30_s19, 128  ;;  %p133_p4 = scmp.lt.s32.totalorder %s30_s19, %s30_s19 }
   0xa   :  { %p129_p3 = scmp.ne.s32.totalorder %s30_s19, %s128_s29  ;;  %p134_p5 = scmp.lt.s32.totalorder %s128_s29, %s128_s29 }
   0xc   :  { %p135_p6 = por %p134_p5, %p133_p4 }
   0xe   :  { %p136_p7 = pnand %p135_p6, %p129_p3 }
  0x10   :  { %139 = shalt.err (!%p136_p7)
}
  0x11   :  { %32 = dma.hbm_to_vmem [thread:$0]  %s272_s1, 128, %s30_s19, [#allocation5]  }
  0x12   :  { %s140_s9 = scalar_lea.hbm %s271_s0, 128 }
  0x13   :  { %p141_p8 = scmp.ne.s32.totalorder %s271_s0, %s140_s9  ;;  %p144_p9 = scmp.lt.u32.totalorder %s140_s9, %s271_s0 }
  0x15   :  { %p146_p10 = pnand %p144_p9, %p141_p8 }
  0x17   :  { %149 = shalt.err (!%p146_p10)
}
  0x18   :  { %s150_s14 = scalar_lea.vmem %s20_s21, 128  ;;  %p155_p12 = scmp.lt.s32.totalorder %s20_s21, %s20_s21 }
  0x19   :  { %p151_p11 = scmp.ne.s32.totalorder %s20_s21, %s150_s14  ;;  %p156_p13 = scmp.lt.s32.totalorder %s150_s14, %s150_s14 }
  0x1b   :  { %p157_p0 = por %p156_p13, %p155_p12 }
  0x1d   :  { %p158_p1 = pnand %p157_p0, %p151_p11 }
  0x1f   :  { %161 = shalt.err (!%p158_p1)
}
  0x20   :  { %22 = dma.hbm_to_vmem [thread:$0]  %s271_s0, 128, %s20_s21, [#allocation3]  }
  0x21   :  { %s190_s16 = smov [#allocation6]   ;;  %s162_s20 = scalar_lea.hbm %s273_s2, 128 }
  0x22   :  { %s39_s17 = sshll.u32 %s190_s16, 4  ;;  %p163_p2 = scmp.ne.s32.totalorder %s273_s2, %s162_s20  ;;  %s40_s17 = int_to_ptr.vmem [resolvable:$true] %s39_s17 }
  0x23   :  { %p166_p3 = scmp.lt.u32.totalorder %s162_s20, %s273_s2 }
  0x25   :  { %p168_p4 = pnand %p166_p3, %p163_p2 }
  0x27   :  { %171 = shalt.err (!%p168_p4)
}
  0x28   :  { %s172_s26 = scalar_lea.vmem %s40_s17, 128  ;;  %p177_p6 = scmp.lt.s32.totalorder %s40_s17, %s40_s17 }
  0x29   :  { %p173_p5 = scmp.ne.s32.totalorder %s40_s17, %s172_s26  ;;  %p178_p7 = scmp.lt.s32.totalorder %s172_s26, %s172_s26 }
  0x2b   :  { %p179_p8 = por %p178_p7, %p177_p6 }
  0x2d   :  { %p180_p9 = pnand %p179_p8, %p173_p5 }
  0x2f   :  { %183 = shalt.err (!%p180_p9)
}
  0x30   :  { %42 = dma.hbm_to_vmem [thread:$0]  %s273_s2, 128, %s40_s17, [#allocation5]  }
  0x31   :  { %184 = dma.done.wait [#allocation3], 128  }
  0x32   :  { %185 = vsyncadd [#allocation3], 4294967168 }
  0x33   :  { %186 = dma.done.wait [#allocation5], 256  }
  0x34   :  { %187 = vsyncadd [#allocation5], 4294967040  ;;  %v54_v0 = vld [vmem:[#allocation6] sm:$0xff]  ;;  %vm56_vm0 = vcmask 261120   ;;  %v52_v1 = vld [vmem:[#allocation2] sm:$0xff]  ;;  %vm91_vm1 = vcmask 7168  }
  0x35   :  { %v53_v2 = vld [vmem:[#allocation4] sm:$0xff]  ;;  %v76_v3 = vmul.f32 %v54_v0, %v54_v0  ;;  %v64_v4 = vmul.f32 %v52_v1, %v52_v1  ;;  %v60_v10 = vmul.f32 %v54_v0, %v52_v1 }
  0x36   :  { %v70_v5 = vmul.f32 %v53_v2, %v53_v2  ;;  %v55_v6 = vmul.f32 %v53_v2, %v52_v1 }
  0x37   :  { %v77_v7 = vsel %vm56_vm0, %v76_v3, 0.0  ;;  %v65_v8 = vsel %vm56_vm0, %v64_v4, 0.0  ;;  %v61_v12 = vsel %vm56_vm0, %v60_v10, 0.0 }
  0x38   :  { %78 = vadd.xlane.f32.xlu1 %v77_v7  ;;  %66 = vadd.xlane.f32.xlu0 %v65_v8  ;;  %v71_v9 = vsel %vm56_vm0, %v70_v5, 0.0  ;;  %v57_v11 = vsel %vm56_vm0, %v55_v6, 0.0 }
  0x3c   :  { %72 = vadd.xlane.f32.xlu0 %v71_v9  ;;  %58 = vadd.xlane.f32.xlu1 %v57_v11 }
  0x40   :  { %62 = vadd.xlane.f32.xlu0 %v61_v12 }
  0xc5   :  { %v79_v13 = vpop.xlane.xlu1 %78  ;;  %v67_v14 = vpop.xlane.xlu0 %66 }
  0xc6   :  { %v80_v15 = vmax.f32 %v79_v13, 1e-24  ;;  %v68_v16 = vmax.f32 %v67_v14, 1e-24 }
  0xc8   :  { %112 = vrsqrt.f32 %v80_v15 }
  0xc9   :  { %114 = vrsqrt.f32 %v68_v16  ;;  %v73_v17 = vpop.xlane.xlu0 %72  ;;  %v59_v25 = vpop.xlane.xlu1 %58 }
  0xca   :  { %v74_v18 = vmax.f32 %v73_v17, 1e-24 }
  0xcc   :  { %116 = vrsqrt.f32 %v74_v18 }
  0xcd   :  { %v63_v21 = vpop.xlane.xlu0 %62 }
  0xd2   :  { %v113_v19 = vpop.eup %112 }
  0xd3   :  { %v115_v20 = vpop.eup %114 }
  0xd4   :  { %v85_v22 = vmul.f32 %v115_v20, %v113_v19 }
  0xd6   :  { %v117_v23 = vpop.eup %116  ;;  %v86_v24 = vmul.f32 %v85_v22, %v63_v21 }
  0xd7   :  { %v82_v26 = vmul.f32 %v117_v23, %v115_v20 }
  0xd8   :  { %v87_v27 = vsub.f32 1.0, %v86_v24 }
  0xd9   :  { %v83_v28 = vmul.f32 %v82_v26, %v59_v25 }
  0xda   :  { %93 = vst.msk [vmem:[%s275_s4] sm:$0xff] %vm91_vm1, %v87_v27 }
  0xdb   :  { %v84_v29 = vsub.f32 1.0, %v83_v28 }
  0xdd   :  { %v88_v30 = vadd.f32 0.3, %v84_v29  ;;  %92 = vst.msk [vmem:[%s274_s3] sm:$0xff] %vm91_vm1, %v84_v29 }
  0xdf   :  { %v89_v31 = vsub.f32 %v88_v30, %v87_v27 }
  0xe1   :  { %v90_v32 = vmax.f32 %v89_v31, 0.0 }
  0xe3   :  { %94 = vst.msk [vmem:[%s276_s5] sm:$0xff] %vm91_vm1, %v90_v32 }
  0xe4   :  { %107 = vsyncpa [#allocation3], 1 }
  0xe5   :  { %108 = vsyncpa [#allocation5], 1 }

</bundles_post_ra>
